<compile_context>
chip_gen: v6e
topology: v6e:2x2x1
jax: 0.10.0
libtpu: 0.0.40
codegen_flags: <defaults>
</compile_context>

<pallas_src>
import functools
import math

import jax
import jax.numpy as jnp
from jax.experimental import pallas as pl
from jax.experimental.pallas import tpu as pltpu


# --------------------------------------------------------------------------------------
# Parameter-only precompute: hsum[n*W + w] = sum_c heads[n, w, c]
# --------------------------------------------------------------------------------------
def _reduce_heads_kernel(h_ref, out_ref):
    # h_ref: (rows_block, C) slab of heads in (n*W + w, chunk) layout.
    # Reduce the chunk (lane) axis in f32 -> (rows_block, 1) column.
    out_ref[...] = jnp.sum(h_ref[...].astype(jnp.float32), axis=-1, keepdims=True)


def reduce_heads(heads):
    """heads: (N, W, C) -> (1, N*W) f32 row with hsum[0, n*W+w] = sum_c heads[n, w, c].

    Depends only on the static parameter; run once (via make_chunking_splitter) and
    cache the result across forward calls.
    """
    n_sv, w_dim, chunk = heads.shape
    nw = n_sv * w_dim
    # Free, contiguous reshape (no wrapper-side transpose / extra HBM pass of heads).
    heads_flat = heads.reshape(nw, chunk)
    itemsize = heads_flat.dtype.itemsize

    # Pick the largest row block that (a) divides N*W, (b) is a multiple of 8 (sublane
    # tiling), (c) keeps the input block <= ~1 MiB (mem-bound blocks this size already
    # sit near HBM roofline), and (d) leaves >= 2 grid steps so v7x can shard the
    # "parallel" axis across both TensorCores. Fallback: the whole array in one step.
    budget = 1 << 20
    cands = [r for r in range(8, nw // 2 + 1, 8)
             if nw % r == 0 and r * chunk * itemsize <= budget]
    rows_block = max(cands) if cands else nw

    col = pl.pallas_call(
        _reduce_heads_kernel,
        out_shape=jax.ShapeDtypeStruct((nw, 1), jnp.float32),
        grid=(nw // rows_block,),
        in_specs=[pl.BlockSpec((rows_block, chunk), lambda g: (g, 0))],
        out_specs=pl.BlockSpec((rows_block, 1), lambda g: (g, 0)),
        compiler_params=pltpu.CompilerParams(dimension_semantics=("parallel",)),
    )(heads_flat)
    # (N*W, 1) -> (1, N*W) is a pure contiguous reshape of a ~KB array.
    return col.reshape(1, nw)


# --------------------------------------------------------------------------------------
# Per-call apply kernel: out[b, n*W + w] = (x @ W1^T + b1)[b, w] * hsum[n*W + w]
# --------------------------------------------------------------------------------------
def _splitter_apply_kernel(x_ref, w1t_ref, b1_ref, hsum_ref, out_ref, acc_ref,
                           *, n_sv, w_dim):
    k = pl.program_id(0)

    @pl.when(k == 0)
    def _():
        acc_ref[...] = jnp.zeros_like(acc_ref)

    # Contraction-tiled Linear on the MXU with f32 accumulation.
    acc_ref[...] += jnp.dot(x_ref[...], w1t_ref[...],
                            preferred_element_type=jnp.float32)

    @pl.when(k == pl.num_programs(0) - 1)
    def _():
        y = acc_ref[...] + b1_ref[...]          # (B, W) f32
        # N short static stores instead of jnp.tile: only y plus one W-wide slab are
        # live at a time; each store is lane-dense when W is a multiple of 128.
        for n in range(n_sv):
            sl = pl.ds(n * w_dim, w_dim)        # static offset
            out_ref[:, sl] = (y * hsum_ref[:, sl]).astype(out_ref.dtype)


def _pick_f_block(f_dim, w_dim, itemsize=4, budget=4 << 20):
    # Largest contraction block tk that divides F, is a multiple of 128, and keeps the
    # double-buffered weight block (2 * tk * W * itemsize) within budget — comfortably
    # under v5e's 16 MiB / v7x's 32 MiB scoped-VMEM defaults. Whole F when it fits.
    if 2 * f_dim * w_dim * itemsize <= budget:
        return f_dim
    cands = [t for t in range(128, f_dim, 128)
             if f_dim % t == 0 and 2 * t * w_dim * itemsize <= budget]
    return max(cands) if cands else f_dim


def _chunking_splitter_apply(x, w1_t, b1_row, hsum_row, n_sv, w_dim):
    b_sz, f_dim = x.shape
    nw = n_sv * w_dim
    assert w1_t.shape == (f_dim, w_dim)
    assert b1_row.shape == (1, w_dim)
    assert hsum_row.shape == (1, nw)

    tk = _pick_f_block(f_dim, w_dim, itemsize=w1_t.dtype.itemsize)
    kernel = functools.partial(_splitter_apply_kernel, n_sv=n_sv, w_dim=w_dim)

    out_flat = pl.pallas_call(
        kernel,
        out_shape=jax.ShapeDtypeStruct((b_sz, nw), x.dtype),
        grid=(f_dim // tk,),
        in_specs=[
            pl.BlockSpec((b_sz, tk), lambda k: (0, k)),      # x (contraction-tiled)
            pl.BlockSpec((tk, w_dim), lambda k: (k, 0)),     # W1^T (contraction-tiled)
            pl.BlockSpec((1, w_dim), lambda k: (0, 0)),      # bias
            pl.BlockSpec((1, nw), lambda k: (0, 0)),         # pre-reduced heads row
        ],
        out_specs=pl.BlockSpec((b_sz, nw), lambda k: (0, 0)),
        scratch_shapes=[pltpu.VMEM((b_sz, w_dim), jnp.float32)],
        compiler_params=pltpu.CompilerParams(
            dimension_semantics=("arbitrary",)),             # contraction axis
    )(x, w1_t, b1_row, hsum_row)

    # Free contiguous reshape to the PyTorch output layout (B, N, W) — no transpose.
    return out_flat.reshape(b_sz, n_sv, w_dim)


def make_chunking_splitter(w1, b1, heads):
    """One-time parameter precompute; returns apply(x) -> (B, N, W).

    w1: (W, F) PyTorch Linear weight, b1: (W,), heads: (N, W, C).
    The returned closure caches hsum, W1^T and the bias row across forward calls, so
    steady-state per-call HBM traffic is just x, W1^T, hsum and the output.
    """
    n_sv, w_dim, _ = heads.shape
    f_dim = w1.shape[1]
    assert w1.shape == (w_dim, f_dim) and b1.shape == (w_dim,)

    # Parameter-only precompute, executed exactly once here:
    hsum_row = reduce_heads(heads)                               # (1, N*W) f32, Pallas
    w1_t = jnp.transpose(w1)                                     # (F, W), cached
    b1_row = jnp.reshape(b1, (1, w_dim)).astype(jnp.float32)     # (1, W) f32, cached

    def apply(x):
        return _chunking_splitter_apply(x, w1_t, b1_row, hsum_row, n_sv, w_dim)

    return apply


def chunking_splitter(x, w1, b1, heads):
    """One-shot convenience wrapper. For repeated forwards, build the closure once with
    make_chunking_splitter so the parameter-only precompute is not re-run per call."""
    return make_chunking_splitter(w1, b1, heads)(x)


if __name__ == "__main__":
    # Small, module-consistent shapes.
    num_style_vectors = 4      # N
    w_space_dim = 32           # W
    out_channels = 8           # per-style-vector channels feeding the Linear
    chunk_size = 512           # matches the hard-coded `.repeat(1, 512, 1)`
    batch = 2                  # B
    in_features = out_channels * num_style_vectors  # F = 32

    key = jax.random.PRNGKey(0)
    k_x, k_w1, k_b1, k_h = jax.random.split(key, 4)

    # Deterministic parameter init (mirrors the module's init shapes/scales).
    lin_bound = 1.0 / math.sqrt(in_features)
    w1 = jax.random.uniform(
        k_w1, (w_space_dim, in_features), jnp.float32, -lin_bound, lin_bound
    )
    b1 = jax.random.uniform(
        k_b1, (w_space_dim,), jnp.float32, -lin_bound, lin_bound
    )
    heads = jax.random.normal(
        k_h, (num_style_vectors, w_space_dim, chunk_size), jnp.float32
    ) / math.sqrt((chunk_size + w_space_dim) / 2.0)

    x = jax.random.normal(k_x, (batch, in_features), jnp.float32)

    # Build once (parameter-only precompute), call the cheap apply path.
    forward = make_chunking_splitter(w1, b1, heads)
    out = forward(x)
    jax.block_until_ready(out)

    # Pure-JAX reference of the same semantics.
    y_ref = x @ w1.T + b1                                    # (B, W)
    ref = y_ref[:, None, :] * jnp.sum(heads, axis=-1)[None]  # (B, N, W)

    assert out.shape == (batch, num_style_vectors, w_space_dim)
    assert jnp.allclose(out, ref, atol=1e-4, rtol=1e-4)
    print("KERNEL_OK")
</pallas_src>

<mosaic_0001>
module attributes {stable_mosaic.version = 11 : i64} {
  func.func @_reduce_heads_kernel(%arg0: i32, %arg1: memref<64x512xf32, #tpu.memory_space<vmem>>, %arg2: memref<64x1xf32, #tpu.memory_space<vmem>>) attributes {dimension_semantics = [#tpu.dimension_semantics<parallel>], iteration_bounds = array<i64: 2>, scalar_prefetch = 0 : i64, scratch_operands = 0 : i64, tpu.core_type = #tpu.core_type<tc>, window_params = [{transform_indices = @transform_0, window_bounds = array<i64: 64, 512>}, {transform_indices = @transform_1, window_bounds = array<i64: 64, 1>}]} {
    %c0 = arith.constant 0 : index
    %c0_0 = arith.constant 0 : index
    %0 = vector.load %arg1[%c0, %c0_0] : memref<64x512xf32, #tpu.memory_space<vmem>>, vector<64x512xf32>
    %cst = arith.constant dense<0.000000e+00> : vector<64xf32>
    %1 = vector.multi_reduction <add>, %0, %cst [1] : vector<64x512xf32> to vector<64xf32>
    %2 = vector.shape_cast %1 : vector<64xf32> to vector<64x1xf32>
    %c0_1 = arith.constant 0 : index
    %c0_2 = arith.constant 0 : index
    %3 = vector.load %arg2[%c0_1, %c0_2] : memref<64x1xf32, #tpu.memory_space<vmem>>, vector<64x1xf32>
    tpu.vector_store %arg2[%c0_1, %c0_2], %2 {strides = array<i32>} : memref<64x1xf32, #tpu.memory_space<vmem>>, vector<64x1xf32>,
    return
  }
  func.func @transform_0(%arg0: i32) -> (i32, i32) {
    %c0_i32 = arith.constant 0 : i32
    %c0_i32_0 = arith.constant 0 : i32
    return %arg0, %c0_i32 : i32, i32
  }
  func.func @transform_1(%arg0: i32) -> (i32, i32) {
    %c0_i32 = arith.constant 0 : i32
    %c0_i32_0 = arith.constant 0 : i32
    return %arg0, %c0_i32 : i32, i32
  }
}

</mosaic_0001>

<bundles_post_ra>
// kernel: tpu_custom_call.1
= control target key start
LH: loop header
LB: loop body
LE: loop exit
PB: predicated region body
PF: predicated region fallthrough
CT: control target
= control target key end

     0   :  { %6 = vsyncpa [#allocation3], 0  ;;  %s564_s0 = inlined_call_operand.hbm [shape: f32[128,512], index: 0, kind: input, shape index: {}]   ;;  %s565_s1 = inlined_call_operand.vmem [shape: f32[128,1], index: 1, kind: output, shape index: {}]  }
   0x1   :  { %8 = vsyncpa [#allocation3 + $0x1], 0  ;;  %s422_s6 = smov 0   ;;  %s424_s7 = smov 0  }
   0x2   :  { %s426_s8 = smov 0   ;;  %s428_s9 = smov 0  }
   0x3 LB: > { %s288_s10 = sadd.s32 4294967295, %s407_s9   ;;  %s442_s11 = sadd.s32 1, %s407_s9   ;;  %s407_s9 = sphi %s428_s9, %s574_s9   ;;  %s403_s8 = sphi %s426_s8, %s573_s8   ;;  %s399_s7 = sphi %s424_s7, %s572_s7   ;;  %s395_s6 = sphi %s422_s6, %s571_s6  }
   0x4   : > { %s18_s12 = ssub.s32 %s407_s9, %s442_s11  ;;  %s21_s13 = sadd.s32 1, %s403_s8 }
   0x5   : > { %p19_p0 = scmp.eq.s32.totalorder %s18_s12, 0  ;;  %p28_p1 = scmp.ne.s32.totalorder %s403_s8, %s399_s7 }
   0x6   : > { %p29_p2 = scmp.eq.s32.totalorder %s407_s9, 0  ;;  %p34_p3 = scmp.ne.s32.totalorder %s399_s7, %s395_s6 }
   0x7   : > { %s452_s14 = scalar_select %p19_p0, %s403_s8, %s21_s13  }
   0x8   : > { %p30_p4 = por %p29_p2, %p28_p1  ;;  %p35_p5 = scmp.eq.s32.totalorder %s288_s10, 0 }
   0x9   : > { %p310_p6 = scmp.lt.s32.totalorder %s407_s9, 2  ;;  %s84_s16 = sand.u32 1, %s403_s8  }
   0xa   : > { %p457_p7 = por %p35_p5, %p34_p3  ;;  %s292_s17 = sshll.u32 %s84_s16, 8 }
   0xb   : > { %s303_s18 = sshll.u32 %s407_s9, 12  ;;  %s88_s22 = scalar_lea.vmem [#allocation2], %s292_s17 }
   0xc   : > { %s567_s15 = scalar_select %p457_p7, 1, 0 }
   0xd   : > { %s466_s21 = scalar_lea.hbm %s564_s0, %s303_s18  ;;  %s96_s23 = sshll.u32 %s88_s22, 4  ;;  %s468_s23 = int_to_ptr.vmem [resolvable:$true] %s96_s23 }
   0xe   : > { %p470_p8 = pnand %p310_p6, %p30_p4  ;;  %s475_s25 = scalar_lea.sflag [#allocation3], %s84_s16 }
   0xf   : > { %s345_s26 = scalar_lea.hbm %s466_s21, 4096  ;;  %s350_s29 = scalar_lea.hbm %s564_s0, 8192 }
  0x10   : > { %p346_p10 = scmp.ne.s32.totalorder %s466_s21, %s345_s26  ;;  %p347_p11 = pneg %p470_p8 }
  0x11   : > { %p351_p0 = scmp.lt.s32.totalorder %s466_s21, %s564_s0  ;;  %p352_p1 = scmp.lt.s32.totalorder %s350_s29, %s345_s26 }
  0x12   : > { %p348_p12 = pnand %p347_p11, %p346_p10 }
  0x13   : > { %p353_p2 = por %p352_p1, %p351_p0 }
  0x14   : > { %p349_p13 = pneg %p348_p12 }
  0x16   : > { %p354_p3 = pnand %p353_p2, %p349_p13 }
  0x18   : > { %357 = shalt.err (!%p354_p3)
}
  0x19   : > { %s358_s3 = scalar_lea.vmem %s468_s23, 4096  ;;  %s409_s4 = smov [#allocation2]  }
  0x1a   : > { %p359_p4 = scmp.ne.s32.totalorder %s468_s23, %s358_s3  ;;  %s363_s5 = sshll.u32 %s409_s4, 4  ;;  %s364_s5 = int_to_ptr.vmem [resolvable:$false] %s363_s5 }
  0x1b   : > { %s365_s6 = scalar_lea.vmem %s364_s5, 8192  ;;  %p366_p10 = scmp.lt.s32.totalorder %s468_s23, %s364_s5 }
  0x1c   : > { %p361_p5 = pnand %p359_p4, %p347_p11  ;;  %p367_p12 = scmp.lt.s32.totalorder %s365_s6, %s358_s3 }
  0x1e   : > { %p362_p6 = pneg %p361_p5  ;;  %p368_p9 = por %p367_p12, %p366_p10 }
  0x20   : > { %p369_p7 = pnand %p368_p9, %p362_p6 }
  0x22   : > { %372 = shalt.err (!%p369_p7)
}
  0x23   : > { %s410_s12 = smov 512   ;;  %s411_s13 = smov 32  }
  0x24   : > { %309 = dma.hbm_to_vmem [thread:$0]  (!%p470_p8), %s466_s21, 4096, %s468_s23, %s475_s25, %s410_s12, %s410_s12, %s411_s13  }
  0x25   : > { %p104_p11 = scmp.lt.s32.totalorder %s407_s9, 3  ;;  %p569_p13 = scmp.ge.s32.totalorder %s407_s9, 1 }
  0x27   : > { %p105_p0 = pnand %p569_p13, %p104_p11 }
  0x28   : > { %s110_s16 = sand.u32 (!%p105_p0), 1, %s399_s7   ;;  %p570_p7 = scmp.ne.s32.totalorder (!%p105_p0), %s567_s15, 0 }
  0x29   : > { %108 = sbr.rel (%p105_p0) target bundleno = 206 (0xce), region = 24  ;;  %s297_s17 = sshll.u32 (!%p105_p0), %s110_s16, 8 }
  0x2a   : > { %s111_s18 = scalar_lea.sflag (!%p105_p0), [#allocation3], %s110_s16  ;;  %s500_s19 = scalar_lea.vmem (!%p105_p0), [#allocation2], %s297_s17 }
  0x2e   : > { %390 = dma.done.wait (%p570_p7), %s111_s18, 4096  }
  0x2f   : > { %392 = vsyncadd (%p570_p7), %s111_s18, 4294963200  ;;  %v148_v0 = vld [vmem:[%s500_s19 + $0x40] sm:$0xff]  ;;  %v149_v1 = vld [vmem:[%s500_s19 + $0x48] sm:$0xff]  ;;  %s298_s15 = sshll.u32 %s288_s10, 3  ;;  %vm212_vm0 = vcmask 7168  }
  0x30   : > { %v150_v2 = vld [vmem:[%s500_s19 + $0x50] sm:$0xff]  ;;  %v182_v3 = vadd.f32 %v149_v1, %v148_v0  ;;  %v140_v4 = vld [vmem:[%s500_s19] sm:$0xff]  ;;  %v141_v5 = vld [vmem:[%s500_s19 + $0x8] sm:$0xff]  ;;  %p135_p8 = scmp.lt.s32.totalorder %s298_s15, 15 }
  0x31   : > { %v151_v6 = vld [vmem:[%s500_s19 + $0x58] sm:$0xff]  ;;  %v142_v7 = vld [vmem:[%s500_s19 + $0x10] sm:$0xff]  ;;  %v172_v8 = vadd.f32 %v141_v5, %v140_v4  ;;  %v152_v9 = vld [vmem:[%s500_s19 + $0x60] sm:$0xff] }
  0x32   : > { %v183_v10 = vadd.f32 %v182_v3, %v150_v2  ;;  %v143_v11 = vld [vmem:[%s500_s19 + $0x18] sm:$0xff]  ;;  %v153_v12 = vld [vmem:[%s500_s19 + $0x68] sm:$0xff]  ;;  %v154_v13 = vld [vmem:[%s500_s19 + $0x70] sm:$0xff]  ;;  %s576_s15 = smov (!%p135_p8, %s298_s15), 15 }
  0x33   : > { %v173_v14 = vadd.f32 %v172_v8, %v142_v7  ;;  %v187_v15 = vadd.f32 %v153_v12, %v152_v9  ;;  %v144_v16 = vld [vmem:[%s500_s19 + $0x20] sm:$0xff]  ;;  %v145_v17 = vld [vmem:[%s500_s19 + $0x28] sm:$0xff]  ;;  %v146_v18 = vld [vmem:[%s500_s19 + $0x30] sm:$0xff]  ;;  %s299_s20 = sshll.u32 %s576_s15, 3 }
  0x34   : > { %v184_v19 = vadd.f32 %v183_v10, %v151_v6  ;;  %v155_v20 = vld [vmem:[%s500_s19 + $0x78] sm:$0xff]  ;;  %v177_v21 = vadd.f32 %v145_v17, %v144_v16  ;;  %v160_v22 = vld [vmem:[%s500_s19 + $0xa0] sm:$0xff]  ;;  %v161_v23 = vld [vmem:[%s500_s19 + $0xa8] sm:$0xff]  ;;  %s138_s23 = scalar_lea.vmem %s565_s1, %s299_s20 }
  0x35   : > { %v174_v24 = vadd.f32 %v173_v14, %v143_v11  ;;  %v188_v25 = vadd.f32 %v187_v15, %v154_v13  ;;  %v147_v26 = vld [vmem:[%s500_s19 + $0x38] sm:$0xff]  ;;  %v162_v27 = vld [vmem:[%s500_s19 + $0xb0] sm:$0xff]  ;;  %v197_v28 = vadd.f32 %v161_v23, %v160_v22  ;;  %v156_v29 = vld [vmem:[%s500_s19 + $0x80] sm:$0xff] }
  0x36   : > { %185 = vadd.xlane.f32.xlu1 %v184_v19  ;;  %v178_v30 = vadd.f32 %v177_v21, %v146_v18  ;;  %v163_v31 = vld [vmem:[%s500_s19 + $0xb8] sm:$0xff]  ;;  %v157_v32 = vld [vmem:[%s500_s19 + $0x88] sm:$0xff]  ;;  %v158_v33 = vld [vmem:[%s500_s19 + $0x90] sm:$0xff] }
  0x37   : > { %175 = vadd.xlane.f32.xlu0 %v174_v24  ;;  %v189_v34 = vadd.f32 %v188_v25, %v155_v20  ;;  %v198_v35 = vadd.f32 %v197_v28, %v162_v27  ;;  %v192_v36 = vadd.f32 %v157_v32, %v156_v29  ;;  %v168_v37 = vld [vmem:[%s500_s19 + $0xe0] sm:$0xff]  ;;  %v169_v38 = vld [vmem:[%s500_s19 + $0xe8] sm:$0xff]  ;;  %v170_v39 = vld [vmem:[%s500_s19 + $0xf0] sm:$0xff] }
  0x38   : > { %v179_v40 = vadd.f32 %v178_v30, %v147_v26  ;;  %v159_v41 = vld [vmem:[%s500_s19 + $0x98] sm:$0xff]  ;;  %v207_v42 = vadd.f32 %v169_v38, %v168_v37  ;;  %v164_v43 = vld [vmem:[%s500_s19 + $0xc0] sm:$0xff]  ;;  %v165_v44 = vld [vmem:[%s500_s19 + $0xc8] sm:$0xff] }
  0x39   : > { %v193_v45 = vadd.f32 %v192_v36, %v158_v33  ;;  %v166_v46 = vld [vmem:[%s500_s19 + $0xd0] sm:$0xff]  ;;  %v202_v47 = vadd.f32 %v165_v44, %v164_v43  ;;  %v199_v48 = vadd.f32 %v198_v35, %v163_v31  ;;  %v171_v51 = vld [vmem:[%s500_s19 + $0xf8] sm:$0xff] }
  0x3a   : > { %190 = vadd.xlane.f32.xlu1 %v189_v34  ;;  %v208_v49 = vadd.f32 %v207_v42, %v170_v39  ;;  %v167_v53 = vld [vmem:[%s500_s19 + $0xd8] sm:$0xff] }
  0x3b   : > { %180 = vadd.xlane.f32.xlu0 %v179_v40  ;;  %v194_v50 = vadd.f32 %v193_v45, %v159_v41  ;;  %v203_v52 = vadd.f32 %v202_v47, %v166_v46 }
  0x3c   : > { %v209_v54 = vadd.f32 %v208_v49, %v171_v51 }
  0x3d   : > { %v204_v55 = vadd.f32 %v203_v52, %v167_v53 }
  0x3e   : > { %200 = vadd.xlane.f32.xlu1 %v199_v48 }
  0x3f   : > { %195 = vadd.xlane.f32.xlu0 %v194_v50 }
  0x42   : > { %210 = vadd.xlane.f32.xlu1 %v209_v54 }
  0x43   : > { %205 = vadd.xlane.f32.xlu0 %v204_v55 }
  0xbf   : > { %v186_v56 = vpop.xlane.xlu1 %185 }
  0xc0   : > { %215 = vst.msk [vmem:[%s138_s23 + $0x10] sm:$0xff] %vm212_vm0, %v186_v56  ;;  %v176_v57 = vpop.xlane.xlu0 %175 }
  0xc1   : > { %213 = vst.msk [vmem:[%s138_s23] sm:$0xff] %vm212_vm0, %v176_v57 }
  0xc3   : > { %v191_v58 = vpop.xlane.xlu1 %190 }
  0xc4   : > { %216 = vst.msk [vmem:[%s138_s23 + $0x18] sm:$0xff] %vm212_vm0, %v191_v58  ;;  %v181_v59 = vpop.xlane.xlu0 %180 }
  0xc5   : > { %214 = vst.msk [vmem:[%s138_s23 + $0x8] sm:$0xff] %vm212_vm0, %v181_v59 }
  0xc7   : > { %v201_v60 = vpop.xlane.xlu1 %200 }
  0xc8   : > { %218 = vst.msk [vmem:[%s138_s23 + $0x28] sm:$0xff] %vm212_vm0, %v201_v60  ;;  %v196_v61 = vpop.xlane.xlu0 %195 }
  0xc9   : > { %217 = vst.msk [vmem:[%s138_s23 + $0x20] sm:$0xff] %vm212_vm0, %v196_v61 }
  0xcb   : > { %v211_v62 = vpop.xlane.xlu1 %210 }
  0xcc   : > { %220 = vst.msk [vmem:[%s138_s23 + $0x38] sm:$0xff] %vm212_vm0, %v211_v62  ;;  %v206_v63 = vpop.xlane.xlu0 %205 }
  0xcd   : > { %219 = vst.msk [vmem:[%s138_s23 + $0x30] sm:$0xff] %vm212_vm0, %v206_v63 }
  0xce PF: > { %p11_p9 = scmp.ge.s32.totalorder %s442_s11, 4   ;;  %s571_s6 = smov %s399_s7 }
  0xcf   : > { %s572_s7 = smov %s403_s8  ;;  %s573_s8 = smov %s452_s14 }
  0xd0   : > { %s574_s9 = smov %s442_s11  ;;  %13 = sbr.rel (!%p11_p9) target bundleno = 3 (0x3), region = 64 }
  0xd5   :  { %243 = vsyncpa [#allocation3], 1 }
  0xd6   :  { %245 = vsyncpa [#allocation3 + $0x1], 1 }

</bundles_post_ra>
